<compile_context>
chip_gen: v5e
topology: v5e:2x2
jax: 0.10.0
libtpu: 0.0.40
codegen_flags: <defaults>
</compile_context>

<pallas_src>
import jax
import jax.numpy as jnp
from jax.experimental import pallas as pl
from jax.experimental.pallas import tpu as pltpu

HIDDEN = 20  # width of fc1..fc4


def mlp_kernel(x_ref, p_ref, o_ref):
    """x_ref: (tb, cols) batch tile; p_ref: packed param slab (cols+3, HIDDEN).

    Slab layout (rows):
      [0:cols]   -> W1 (cols, HIDDEN)   (already transposed to (in, out))
      [cols]     -> b1 (HIDDEN,)
      [cols+1]   -> w_tail = (W2 @ W3 @ W4 @ W5)[:, 0]   (HIDDEN,)
      [cols+2,0] -> b_tail scalar
    """
    cols = x_ref.shape[1]
    x = x_ref[...]                                    # (tb, cols) f32

    w1 = p_ref[0:cols, :]                             # (cols, HIDDEN)
    b1 = p_ref[cols:cols + 1, :]                      # (1, HIDDEN)
    w_tail = p_ref[cols + 1:cols + 2, :]              # (1, HIDDEN)
    b_tail = p_ref[cols + 2:cols + 3, 0:1]            # (1, 1)

    # fc1 on the MXU, sigmoid on the EUP.
    h = jnp.dot(x, w1, preferred_element_type=jnp.float32) + b1
    h = jax.nn.sigmoid(h)                             # (tb, HIDDEN)

    # fc2..fc5 folded into a single per-row projection, done on the VPU/XLU
    # (lane reduction) instead of an N=1 MXU matmul.
    out = jnp.sum(h * w_tail, axis=-1, keepdims=True) + b_tail   # (tb, 1)
    o_ref[...] = out.astype(o_ref.dtype)


def my_classifier_forward(x, params, *, tb=256):
    """params: dict name -> (w, b); w stored as (in, out) (= PyTorch W.T),
    b stored as (1, out)."""
    B, cols = x.shape
    (w1, b1), (w2, b2), (w3, b3), (w4, b4), (w5, b5) = (
        params["fc1"], params["fc2"], params["fc3"], params["fc4"], params["fc5"])

    # --- fold the activation-free tail fc2..fc5 into one projection ---------
    w_tail = w2 @ w3 @ w4 @ w5                         # (HIDDEN, 1)
    b_tail = ((b2 @ w3 + b3) @ w4 + b4) @ w5 + b5      # (1, 1)

    # --- pack all parameters into one small slab (single VMEM input) --------
    slab = jnp.zeros((cols + 3, HIDDEN), jnp.float32)
    slab = slab.at[0:cols, :].set(w1)
    slab = slab.at[cols, :].set(b1[0])
    slab = slab.at[cols + 1, :].set(w_tail[:, 0])
    slab = slab.at[cols + 2, 0].set(b_tail[0, 0])

    # --- pad batch to a tile multiple ---------------------------------------
    B_pad = ((B + tb - 1) // tb) * tb
    x_p = jnp.pad(x, ((0, B_pad - B), (0, 0))) if B_pad != B else x

    grid = (B_pad // tb,)
    out = pl.pallas_call(
        mlp_kernel,
        out_shape=jax.ShapeDtypeStruct((B_pad, 1), jnp.float32),
        grid_spec=pltpu.PrefetchScalarGridSpec(
            num_scalar_prefetch=0,
            grid=grid,
            in_specs=[
                pl.BlockSpec((tb, cols), lambda i: (i, 0)),          # x tile
                pl.BlockSpec((cols + 3, HIDDEN), lambda i: (0, 0)),  # params
            ],
            out_specs=pl.BlockSpec((tb, 1), lambda i: (i, 0)),
        ),
        compiler_params=pltpu.CompilerParams(
            dimension_semantics=("parallel",)),
    )(x_p, slab)
    return out[:B]


def init_params(key, cols):
    """Deterministic init mimicking nn.Linear (uniform(-1/sqrt(fan_in), +))."""
    dims = [(cols, HIDDEN), (HIDDEN, HIDDEN), (HIDDEN, HIDDEN),
            (HIDDEN, HIDDEN), (HIDDEN, 1)]
    names = ["fc1", "fc2", "fc3", "fc4", "fc5"]
    params = {}
    for name, (fan_in, fan_out) in zip(names, dims):
        key, kw, kb = jax.random.split(key, 3)
        bound = 1.0 / jnp.sqrt(jnp.float32(fan_in))
        # stored directly as (in, out) == W.T of the PyTorch (out, in) weight
        w = jax.random.uniform(kw, (fan_in, fan_out), jnp.float32, -bound, bound)
        b = jax.random.uniform(kb, (1, fan_out), jnp.float32, -bound, bound)
        params[name] = (w, b)
    return params


def reference_forward(x, params):
    (w1, b1), (w2, b2), (w3, b3), (w4, b4), (w5, b5) = (
        params["fc1"], params["fc2"], params["fc3"], params["fc4"], params["fc5"])
    h = jax.nn.sigmoid(x @ w1 + b1)
    h = h @ w2 + b2
    h = h @ w3 + b3
    h = h @ w4 + b4
    return h @ w5 + b5


if __name__ == "__main__":
    cols = 32       # number of input features
    batch = 512     # two 256-row tiles

    key = jax.random.PRNGKey(0)
    key, kx = jax.random.split(key)
    x = jax.random.normal(kx, (batch, cols), jnp.float32)
    params = init_params(key, cols)

    out = my_classifier_forward(x, params, tb=256)
    out = jax.block_until_ready(out)

    ref = reference_forward(x, params)
    assert out.shape == (batch, 1)
    # Layer folding re-associates f32 ops; allow a slightly looser tolerance.
    assert jnp.allclose(out, ref, atol=1e-4, rtol=1e-4), "mismatch vs JAX reference"

    print("KERNEL_OK")
</pallas_src>

<mosaic_0001>
module attributes {stable_mosaic.version = 11 : i64} {
  func.func @mlp_kernel(%arg0: i32, %arg1: memref<256x32xf32, #tpu.memory_space<vmem>>, %arg2: memref<35x20xf32, #tpu.memory_space<vmem>>, %arg3: memref<256x1xf32, #tpu.memory_space<vmem>>) attributes {dimension_semantics = [#tpu.dimension_semantics<parallel>], iteration_bounds = array<i64: 2>, scalar_prefetch = 0 : i64, scratch_operands = 0 : i64, tpu.core_type = #tpu.core_type<tc>, window_params = [{transform_indices = @transform_0, window_bounds = array<i64: 256, 32>}, {pipeline_mode = #tpu.pipeline_mode<synchronous>, transform_indices = @transform_1, window_bounds = array<i64: 35, 20>}, {transform_indices = @transform_2, window_bounds = array<i64: 256, 1>}]} {
    %c0 = arith.constant 0 : index
    %c0_0 = arith.constant 0 : index
    %0 = vector.load %arg1[%c0, %c0_0] : memref<256x32xf32, #tpu.memory_space<vmem>>, vector<256x32xf32>
    %c0_1 = arith.constant 0 : index
    %c0_2 = arith.constant 0 : index
    %1 = vector.load %arg2[%c0_1, %c0_2] : memref<35x20xf32, #tpu.memory_space<vmem>>, vector<32x20xf32>
    %c32 = arith.constant 32 : index
    %c0_3 = arith.constant 0 : index
    %2 = vector.load %arg2[%c32, %c0_3] : memref<35x20xf32, #tpu.memory_space<vmem>>, vector<1x20xf32>
    %c33 = arith.constant 33 : index
    %c0_4 = arith.constant 0 : index
    %3 = vector.load %arg2[%c33, %c0_4] : memref<35x20xf32, #tpu.memory_space<vmem>>, vector<1x20xf32>
    %c34 = arith.constant 34 : index
    %c0_5 = arith.constant 0 : index
    %4 = vector.load %arg2[%c34, %c0_5] : memref<35x20xf32, #tpu.memory_space<vmem>>, vector<1x1xf32>
    %cst = arith.constant dense<0.000000e+00> : vector<256x20xf32>
    %5 = tpu.matmul %0, %1, %cst {dimension_numbers = #tpu.dot_dimension_numbers<[1], [0], [0], [1], [0, 0, 1, 1], [], []>} : vector<256x32xf32>, vector<32x20xf32>, vector<256x20xf32> -> vector<256x20xf32>
    %6 = vector.broadcast %2 : vector<1x20xf32> to vector<256x20xf32>
    %7 = arith.addf %5, %6 : vector<256x20xf32>
    %8 = arith.negf %7 : vector<256x20xf32>
    %9 = math.exp %8 : vector<256x20xf32>
    %cst_6 = arith.constant 1.000000e+00 : f32
    %10 = vector.broadcast %cst_6 : f32 to vector<256x20xf32>
    %11 = arith.addf %10, %9 : vector<256x20xf32>
    %12 = arith.divf %10, %11 : vector<256x20xf32>
    %13 = vector.broadcast %3 : vector<1x20xf32> to vector<256x20xf32>
    %14 = arith.mulf %12, %13 : vector<256x20xf32>
    %cst_7 = arith.constant dense<0.000000e+00> : vector<256xf32>
    %15 = vector.multi_reduction <add>, %14, %cst_7 [1] : vector<256x20xf32> to vector<256xf32>
    %16 = vector.shape_cast %15 : vector<256xf32> to vector<256x1xf32>
    %17 = vector.broadcast %4 : vector<1x1xf32> to vector<256x1xf32>
    %18 = arith.addf %16, %17 : vector<256x1xf32>
    %c0_8 = arith.constant 0 : index
    %c0_9 = arith.constant 0 : index
    %19 = vector.load %arg3[%c0_8, %c0_9] : memref<256x1xf32, #tpu.memory_space<vmem>>, vector<256x1xf32>
    tpu.vector_store %arg3[%c0_8, %c0_9], %18 {strides = array<i32>} : memref<256x1xf32, #tpu.memory_space<vmem>>, vector<256x1xf32>,
    return
  }
  func.func @transform_0(%arg0: i32) -> (i32, i32) {
    %c0_i32 = arith.constant 0 : i32
    %c0_i32_0 = arith.constant 0 : i32
    return %arg0, %c0_i32 : i32, i32
  }
  func.func @transform_1(%arg0: i32) -> (i32, i32) {
    %c0_i32 = arith.constant 0 : i32
    %c0_i32_0 = arith.constant 0 : i32
    %c0_i32_1 = arith.constant 0 : i32
    return %c0_i32, %c0_i32_0 : i32, i32
  }
  func.func @transform_2(%arg0: i32) -> (i32, i32) {
    %c0_i32 = arith.constant 0 : i32
    %c0_i32_0 = arith.constant 0 : i32
    return %arg0, %c0_i32 : i32, i32
  }
}

</mosaic_0001>

<bundles_post_ra>
// kernel: tpu_custom_call.1
= control target key start
LH: loop header
LB: loop body
LE: loop exit
PB: predicated region body
PF: predicated region fallthrough
CT: control target
= control target key end

     0   :  { %s1507_s9 = smov 0   ;;  %s2711_s0 = inlined_call_operand.vmem [shape: f32[512,32], index: 0, kind: input, shape index: {}]   ;;  %s2712_s1 = inlined_call_operand.vmem [shape: f32[35,20], index: 1, kind: input, shape index: {}]   ;;  %s2713_s2 = inlined_call_operand.vmem [shape: f32[512,1], index: 2, kind: output, shape index: {}]  }
   0x1 LB: > { %s1257_s10 = sadd.s32 4294967295, %s1490_s9   ;;  %p1261_p0 = scmp.ge.s32.totalorder %s1490_s9, 1  ;;  %s1490_s9 = sphi %s1507_s9, %s12_s9  }
   0x2   : > { %p113_p1 = scmp.lt.s32.totalorder %s1490_s9, 3 }
   0x4   : > { %p114_p2 = pnand %p1261_p0, %p113_p1 }
   0x5   : > { %s1262_s15 = sshll.u32 (!%p114_p2), %s1257_s10, 5 }
   0x6   : > { %117 = sbr.rel (%p114_p2) target bundleno = 432 (0x1b0), region = 28  ;;  %p136_p3 = scmp.lt.s32.totalorder (!%p114_p2), %s1262_s15, 63 }
   0xb   : > { %v182_v0 = vld [vmem:[%s2712_s1 + $0x18] sm:$0xff]  ;;  %v181_v1 = vld [vmem:[%s2712_s1 + $0x10] sm:$0xff]  ;;  %v180_v2 = vld [vmem:[%s2712_s1 + $0x8] sm:$0xff]  ;;  %s2821_s15 = smov (!%p136_p3, %s1262_s15), 63  ;;  %vm187_vm0 = vcmask 261120   ;;  %vm1038_vm6 = vcmask 162816  }
   0xc   : > { %296 = vmatpush.msra.mxu0 %v182_v0  ;;  %1333 = vmatpush.msra.mxu2 %v182_v0  ;;  %v179_v3 = vld [vmem:[%s2712_s1] sm:$0xff]  ;;  %s1263_s20 = sshll.u32 %s2821_s15, 3 }
   0xd   : > { %1334 = vmatpush.msra.mxu3 %v182_v0  ;;  %1332 = vmatpush.msra.mxu1 %v182_v0  ;;  %s1535_s23 = scalar_lea.vmem %s2711_s0, %s1263_s20  ;;  %v1604_v36 = vld [vmem:[%s2712_s1 + $0x20] ss:$0 sm:$0xff]  ;;  %s2589_s6 = scalar_lea.vmem %s2713_s2, %s1263_s20 }
   0xe   : > { %297 = vmatpush.msra.mxu0 %v181_v1  ;;  %1336 = vmatpush.msra.mxu2 %v181_v1  ;;  %v147_v4 = vld [vmem:[%s1535_s23] sm:$0xff]  ;;  %v148_v8 = vld [vmem:[%s1535_s23 + $0x8] sm:$0xff]  ;;  %v149_v12 = vld [vmem:[%s1535_s23 + $0x10] sm:$0xff] }
   0xf   : > { %1337 = vmatpush.msra.mxu3 %v181_v1  ;;  %1335 = vmatpush.msra.mxu1 %v181_v1  ;;  %v163_v5 = vld [vmem:[%s1535_s23 + $0x80] sm:$0xff]  ;;  %v164_v9 = vld [vmem:[%s1535_s23 + $0x88] sm:$0xff]  ;;  %v165_v13 = vld [vmem:[%s1535_s23 + $0x90] sm:$0xff] }
  0x10   : > { %298 = vmatpush.msra.mxu0 %v180_v2  ;;  %1339 = vmatpush.msra.mxu2 %v180_v2  ;;  %v171_v6 = vld [vmem:[%s1535_s23 + $0xc0] sm:$0xff]  ;;  %v172_v10 = vld [vmem:[%s1535_s23 + $0xc8] sm:$0xff]  ;;  %v173_v14 = vld [vmem:[%s1535_s23 + $0xd0] sm:$0xff] }
  0x11   : > { %1340 = vmatpush.msra.mxu3 %v180_v2  ;;  %1338 = vmatpush.msra.mxu1 %v180_v2  ;;  %v155_v7 = vld [vmem:[%s1535_s23 + $0x40] sm:$0xff]  ;;  %v156_v11 = vld [vmem:[%s1535_s23 + $0x48] sm:$0xff]  ;;  %v157_v15 = vld [vmem:[%s1535_s23 + $0x50] sm:$0xff] }
  0x12   : > { %299 = vmatpush.msra.mxu0 %v179_v3  ;;  %1342 = vmatpush.msra.mxu2 %v179_v3  ;;  %v150_v16 = vld [vmem:[%s1535_s23 + $0x18] sm:$0xff]  ;;  %v151_v20 = vld [vmem:[%s1535_s23 + $0x20] sm:$0xff]  ;;  %v168_v24 = vld [vmem:[%s1535_s23 + $0xa8] sm:$0xff] }
  0x13   : > { %1343 = vmatpush.msra.mxu3 %v179_v3  ;;  %1341 = vmatpush.msra.mxu1 %v179_v3  ;;  %v166_v17 = vld [vmem:[%s1535_s23 + $0x98] sm:$0xff]  ;;  %v167_v21 = vld [vmem:[%s1535_s23 + $0xa0] sm:$0xff]  ;;  %v152_v25 = vld [vmem:[%s1535_s23 + $0x28] sm:$0xff] }
  0x14   : > { %1266 = vmatmul.msk.f32.vlgmr.msra.gmra.mxu0 %vm187_vm0, %v147_v4  ;;  %1282 = vmatmul.msk.f32.vlgmr.msra.gmra.mxu2 %vm187_vm0, %v163_v5  ;;  %v158_v18 = vld [vmem:[%s1535_s23 + $0x58] sm:$0xff]  ;;  %v175_v22 = vld [vmem:[%s1535_s23 + $0xe0] sm:$0xff]  ;;  %v160_v26 = vld [vmem:[%s1535_s23 + $0x68] sm:$0xff] }
  0x15   : > { %1290 = vmatmul.msk.f32.vlgmr.msra.gmra.mxu3 %vm187_vm0, %v171_v6  ;;  %1274 = vmatmul.msk.f32.vlgmr.msra.gmra.mxu1 %vm187_vm0, %v155_v7  ;;  %v174_v19 = vld [vmem:[%s1535_s23 + $0xd8] sm:$0xff]  ;;  %v159_v23 = vld [vmem:[%s1535_s23 + $0x60] sm:$0xff]  ;;  %v176_v27 = vld [vmem:[%s1535_s23 + $0xe8] sm:$0xff] }
  0x16   : > { %v169_v28 = vld [vmem:[%s1535_s23 + $0xb0] sm:$0xff]  ;;  %v170_v32 = vld [vmem:[%s1535_s23 + $0xb8] sm:$0xff] }
  0x17   : > { %v153_v29 = vld [vmem:[%s1535_s23 + $0x30] sm:$0xff]  ;;  %v154_v33 = vld [vmem:[%s1535_s23 + $0x38] sm:$0xff] }
  0x18   : > { %v161_v30 = vld [vmem:[%s1535_s23 + $0x70] sm:$0xff]  ;;  %v162_v34 = vld [vmem:[%s1535_s23 + $0x78] sm:$0xff] }
  0x19   : > { %v177_v31 = vld [vmem:[%s1535_s23 + $0xf0] sm:$0xff]  ;;  %v178_v35 = vld [vmem:[%s1535_s23 + $0xf8] sm:$0xff] }
  0x1c   : > { %1267 = vmatmul.msk.f32.gmra.mxu0 %vm187_vm0, %v148_v8  ;;  %1283 = vmatmul.msk.f32.gmra.mxu2 %vm187_vm0, %v164_v9 }
  0x1d   : > { %1291 = vmatmul.msk.f32.gmra.mxu3 %vm187_vm0, %v172_v10  ;;  %1275 = vmatmul.msk.f32.gmra.mxu1 %vm187_vm0, %v156_v11 }
  0x24   : > { %1268 = vmatmul.msk.f32.gmra.mxu0 %vm187_vm0, %v149_v12  ;;  %1284 = vmatmul.msk.f32.gmra.mxu2 %vm187_vm0, %v165_v13 }
  0x25   : > { %1292 = vmatmul.msk.f32.gmra.mxu3 %vm187_vm0, %v173_v14  ;;  %1276 = vmatmul.msk.f32.gmra.mxu1 %vm187_vm0, %v157_v15 }
  0x2c   : > { %1269 = vmatmul.msk.f32.gmra.mxu0 %vm187_vm0, %v150_v16  ;;  %1285 = vmatmul.msk.f32.gmra.mxu2 %vm187_vm0, %v166_v17 }
  0x2d   : > { %1277 = vmatmul.msk.f32.gmra.mxu1 %vm187_vm0, %v158_v18  ;;  %1293 = vmatmul.msk.f32.gmra.mxu3 %vm187_vm0, %v174_v19 }
  0x34   : > { %1270 = vmatmul.msk.f32.gmra.mxu0 %vm187_vm0, %v151_v20  ;;  %1286 = vmatmul.msk.f32.gmra.mxu2 %vm187_vm0, %v167_v21 }
  0x35   : > { %1294 = vmatmul.msk.f32.gmra.mxu3 %vm187_vm0, %v175_v22  ;;  %1278 = vmatmul.msk.f32.gmra.mxu1 %vm187_vm0, %v159_v23 }
  0x3c   : > { %1287 = vmatmul.msk.f32.gmra.mxu2 %vm187_vm0, %v168_v24  ;;  %1271 = vmatmul.msk.f32.gmra.mxu0 %vm187_vm0, %v152_v25 }
  0x3d   : > { %1279 = vmatmul.msk.f32.gmra.mxu1 %vm187_vm0, %v160_v26  ;;  %1295 = vmatmul.msk.f32.gmra.mxu3 %vm187_vm0, %v176_v27 }
  0x44   : > { %1288 = vmatmul.msk.f32.gmra.mxu2 %vm187_vm0, %v169_v28  ;;  %1272 = vmatmul.msk.f32.gmra.mxu0 %vm187_vm0, %v153_v29 }
  0x45   : > { %1280 = vmatmul.msk.f32.gmra.mxu1 %vm187_vm0, %v161_v30  ;;  %1296 = vmatmul.msk.f32.gmra.mxu3 %vm187_vm0, %v177_v31 }
  0x4c   : > { %1289 = vmatmul.msk.f32.gmra.mxu2 %vm187_vm0, %v170_v32  ;;  %1273 = vmatmul.msk.f32.gmra.mxu0 %vm187_vm0, %v154_v33 }
  0x4d   : > { %1281 = vmatmul.msk.f32.gmra.mxu1 %vm187_vm0, %v162_v34  ;;  %1297 = vmatmul.msk.f32.gmra.mxu3 %vm187_vm0, %v178_v35 }
  0x91   : > { %v301_v37 = vpop.f32.mrf.mxu0 }
  0x92   : > { %v302_v38 = vadd.f32 %v1604_v36, %v301_v37  ;;  %v325_v39 = vpop.f32.mrf.mxu1 }
  0x93   : > { %v326_v40 = vadd.f32 %v1604_v36, %v325_v39 }
  0x94   : > { %v1298_v41 = vmul.f32 -1.442695, %v302_v38 }
  0x95   : > { %v1306_v42 = vmul.f32 -1.442695, %v326_v40 }
  0x96   : > { %1355 = vpow2.f32 %v1298_v41 }
  0x97   : > { %1357 = vpow2.f32 %v1306_v42  ;;  %v349_v43 = vpop.f32.mrf.mxu2 }
  0x98   : > { %v350_v44 = vadd.f32 %v1604_v36, %v349_v43  ;;  %v373_v45 = vpop.f32.mrf.mxu3 }
  0x99   : > { %v374_v46 = vadd.f32 %v1604_v36, %v373_v45  ;;  %v304_v47 = vpop.f32.mrf.mxu0 }
  0x9a   : > { %v1314_v48 = vmul.f32 -1.442695, %v350_v44  ;;  %v305_v49 = vadd.f32 %v1604_v36, %v304_v47  ;;  %v328_v50 = vpop.f32.mrf.mxu1 }
  0x9b   : > { %v1322_v51 = vmul.f32 -1.442695, %v374_v46  ;;  %v329_v52 = vadd.f32 %v1604_v36, %v328_v50 }
  0x9c   : > { %v1356_v53 = vpop.eup %1355  ;;  %1359 = vpow2.f32 %v1314_v48  ;;  %v1299_v54 = vmul.f32 -1.442695, %v305_v49  ;;  %v1679_v49 = vld [vmem:[%s2712_s1 + $0x21] ss:$0 sm:$0xff] }
  0x9d   : > { %v1358_v55 = vpop.eup %1357  ;;  %v1612_v56 = vadd.f32 1.0, %v1356_v53  ;;  %1361 = vpow2.f32 %v1322_v51  ;;  %v1307_v57 = vmul.f32 -1.442695, %v329_v52 }
  0x9e   : > { %v1614_v58 = vadd.f32 1.0, %v1358_v55  ;;  %1363 = vpow2.f32 %v1299_v54 }
  0x9f   : > { %1365 = vrcp.f32 %v1612_v56  ;;  %v352_v59 = vpop.f32.mrf.mxu2  ;;  %v536_v62 = vand.u32 2147483648, %v1612_v56  ;;  %vm530_vm1 = vweird.f32 %v1612_v56  ;;  %v534_v5 = vand.u32 2147483647, %v1612_v56 }
  0xa0   : > { %1367 = vrcp.f32 %v1614_v58  ;;  %v353_v60 = vadd.f32 %v1604_v36, %v352_v59  ;;  %v376_v61 = vpop.f32.mrf.mxu3  ;;  %v656_v6 = vand.u32 2147483648, %v1614_v58  ;;  %vm650_vm2 = vweird.f32 %v1614_v58 }
  0xa1   : > { %1369 = vpow2.f32 %v1307_v57  ;;  %v377_v63 = vadd.f32 %v1604_v36, %v376_v61  ;;  %v307_v0 = vpop.f32.mrf.mxu0  ;;  %v654_v10 = vand.u32 2147483647, %v1614_v58  ;;  %v1632_v14 = vor.u32 1.1754944e-38, %v536_v62 }
  0xa2   : > { %v1360_v1 = vpop.eup %1359  ;;  %v1315_v2 = vmul.f32 -1.442695, %v353_v60  ;;  %v308_v3 = vadd.f32 %v1604_v36, %v307_v0  ;;  %v331_v4 = vpop.f32.mrf.mxu1  ;;  %v1639_v18 = vor.u32 1.1754944e-38, %v656_v6  ;;  %vm1647_vm4 = vcmp.eq.f32.partialorder %v534_v5, 8.507059e+37 }
  0xa3   : > { %v1362_v7 = vpop.eup %1361  ;;  %v1625_v8 = vadd.f32 1.0, %v1360_v1  ;;  %v332_v9 = vadd.f32 %v1604_v36, %v331_v4  ;;  %v1323_v13 = vmul.f32 -1.442695, %v377_v63  ;;  %vm1659_vm7 = vcmp.eq.f32.partialorder %v654_v10, 8.507059e+37 }
  0xa4   : > { %v1364_v11 = vpop.eup %1363  ;;  %v1630_v12 = vadd.f32 1.0, %v1362_v7  ;;  %1371 = vpow2.f32 %v1315_v2  ;;  %v1300_v17 = vmul.f32 -1.442695, %v308_v3 }
  0xa5   : > { %v1634_v15 = vpop.eup %1365  ;;  %1373 = vrcp.f32 %v1625_v8  ;;  %v1637_v16 = vadd.f32 1.0, %v1364_v11  ;;  %v1308_v20 = vmul.f32 -1.442695, %v332_v9  ;;  %v774_v26 = vand.u32 2147483647, %v1625_v8 }
  0xa6   : > { %v1641_v19 = vpop.eup %1367  ;;  %1375 = vrcp.f32 %v1630_v12  ;;  %v526_v21 = vmul.f32 %v1634_v15, %v1612_v56  ;;  %vm531_vm3 = vweird.f32 %v1634_v15  ;;  %v776_v35 = vand.u32 2147483648, %v1625_v8 }
  0xa7   : > { %v1370_v23 = vpop.eup %1369  ;;  %1377 = vrcp.f32 %v1637_v16  ;;  %v355_v24 = vpop.f32.mrf.mxu2  ;;  %v646_v25 = vmul.f32 %v1641_v19, %v1614_v58  ;;  %vm651_vm5 = vweird.f32 %v1641_v19  ;;  %vm770_vm8 = vweird.f32 %v1625_v8  ;;  %vm532_vm9 = vmor %vm530_vm1, %vm531_vm3 }
  0xa8   : > { %v1656_v27 = vadd.f32 1.0, %v1370_v23  ;;  %1379 = vpow2.f32 %v1323_v13  ;;  %v379_v28 = vpop.f32.mrf.mxu3  ;;  %v356_v29 = vadd.f32 %v1604_v36, %v355_v24  ;;  %v527_v30 = vsub.f32 1.0, %v526_v21  ;;  %vm1699_vm11 = vmor %vm650_vm2, %vm651_vm5 }
  0xa9   : > { %1381 = vpow2.f32 %v1300_v17  ;;  %v380_v32 = vadd.f32 %v1604_v36, %v379_v28  ;;  %v310_v33 = vpop.f32.mrf.mxu0  ;;  %v647_v34 = vsub.f32 1.0, %v646_v25  ;;  %vm1703_vm12 = vcmp.eq.f32.partialorder %v774_v26, 8.507059e+37 }
  0xaa   : > { %v1372_v37 = vpop.eup %1371  ;;  %1383 = vrcp.f32 %v1656_v27  ;;  %v311_v38 = vadd.f32 %v1604_v36, %v310_v33  ;;  %v334_v39 = vpop.f32.mrf.mxu1  ;;  %v1316_v40 = vmul.f32 -1.442695, %v356_v29  ;;  %v528_v41 = vmul.f32 %v1634_v15, %v527_v30 }
  0xab   : > { %v1668_v42 = vpop.eup %1373  ;;  %v1670_v43 = vadd.f32 1.0, %v1372_v37  ;;  %1385 = vpow2.f32 %v1308_v20  ;;  %v1324_v44 = vmul.f32 -1.442695, %v380_v32  ;;  %v335_v45 = vadd.f32 %v1604_v36, %v334_v39 }
  0xac   : > { %v1673_v46 = vpop.eup %1375  ;;  %v1301_v47 = vmul.f32 -1.442695, %v311_v38  ;;  %1387 = vpow2.f32 %v1316_v40  ;;  %v529_v48 = vadd.f32 %v1634_v15, %v528_v41  ;;  %v648_v50 = vmul.f32 %v1641_v19, %v647_v34 }
  0xad   : > { %v1683_v51 = vpop.eup %1377  ;;  %1389 = vrcp.f32 %v1670_v43  ;;  %v1309_v52 = vmul.f32 -1.442695, %v335_v45  ;;  %v766_v53 = vmul.f32 %v1668_v42, %v1625_v8  ;;  %vm771_vm10 = vweird.f32 %v1668_v42 }
  0xae   : > { %v1380_v54 = vpop.eup %1379  ;;  %1391 = vpow2.f32 %v1324_v44  ;;  %v533_v55 = vsel %vm532_vm9, %v1634_v15, %v529_v48  ;;  %v649_v57 = vadd.f32 %v1641_v19, %v648_v50  ;;  %v777_v60 = vor.u32 1.1754944e-38, %v776_v35  ;;  %vm772_vm13 = vmor %vm770_vm8, %vm771_vm10 }
  0xaf   : > { %v1382_v61 = vpop.eup %1381  ;;  %v1707_v62 = vadd.f32 1.0, %v1380_v54  ;;  %1393 = vpow2.f32 %v1301_v47  ;;  %v358_v63 = vpop.f32.mrf.mxu2  ;;  %v538_v0 = vsel %vm1647_vm4, %v1632_v14, %v533_v55  ;;  %v767_v1 = vsub.f32 1.0, %v766_v53 }
  0xb0   : > { %v1712_v58 = vpop.eup %1383  ;;  %v1714_v2 = vadd.f32 1.0, %v1382_v61  ;;  %1395 = vpow2.f32 %v1309_v52  ;;  %v359_v3 = vadd.f32 %v1604_v36, %v358_v63  ;;  %v382_v4 = vpop.f32.mrf.mxu3  ;;  %v1006_v5 = vmul.f32 %v1679_v49, %v538_v0 }
  0xb1   : > { %v1386_v6 = vpop.eup %1385  ;;  %1397 = vrcp.f32 %v1707_v62  ;;  %v313_v7 = vpop.f32.mrf.mxu0  ;;  %v383_v9 = vadd.f32 %v1604_v36, %v382_v4  ;;  %v653_v10 = vsel %vm1699_vm11, %v1641_v19, %v649_v57  ;;  %v768_v11 = vmul.f32 %v1668_v42, %v767_v1 }
  0xb2   : > { %v1388_v13 = vpop.eup %1387  ;;  %1399 = vrcp.f32 %v1714_v2  ;;  %v1725_v14 = vadd.f32 1.0, %v1386_v6  ;;  %v314_v15 = vadd.f32 %v1604_v36, %v313_v7  ;;  %v1317_v17 = vmul.f32 -1.442695, %v359_v3  ;;  %v337_v20 = vpop.f32.mrf.mxu1 }
  0xb3   : > { %v1728_v21 = vpop.eup %1389  ;;  %v1730_v22 = vadd.f32 1.0, %v1388_v13  ;;  %v1325_v23 = vmul.f32 -1.442695, %v383_v9  ;;  %v1039_v24 = vsel %vm1038_vm6, %v1006_v5, 0.0  ;;  %v658_v19 = vsel %vm1659_vm7, %v1639_v18, %v653_v10 }
  0xb4   : > { %v1392_v25 = vpop.eup %1391  ;;  %1401 = vrcp.f32 %v1725_v14  ;;  %v1302_v26 = vmul.f32 -1.442695, %v314_v15  ;;  %1040 = vadd.xlane.f32.xlu0 %v1039_v24  ;;  %v1014_v28 = vmul.f32 %v1679_v49, %v658_v19  ;;  %v769_v29 = vadd.f32 %v1668_v42, %v768_v11 }
  0xb5   : > { %v1394_v30 = vpop.eup %1393  ;;  %v1739_v32 = vadd.f32 1.0, %v1392_v25  ;;  %1403 = vrcp.f32 %v1730_v22  ;;  %v338_v18 = vadd.f32 %v1604_v36, %v337_v20  ;;  %v886_v31 = vmul.f32 %v1673_v46, %v1630_v12 }
  0xb6   : > { %v1396_v33 = vpop.eup %1395  ;;  %v1749_v34 = vadd.f32 1.0, %v1394_v30  ;;  %1405 = vpow2.f32 %v1302_v26  ;;  %v1063_v35 = vsel %vm1038_vm6, %v1014_v28, 0.0  ;;  %v773_v37 = vsel %vm772_vm13, %v1668_v42, %v769_v29 }
  0xb7   : > { %v1753_v38 = vpop.eup %1397  ;;  %1407 = vrcp.f32 %v1739_v32  ;;  %v1756_v39 = vadd.f32 1.0, %v1396_v33  ;;  %1064 = vadd.xlane.f32.xlu2 %v1063_v35  ;;  %v778_v8 = vsel %vm1703_vm12, %v777_v60, %v773_v37  ;;  %v1310_v40 = vmul.f32 -1.442695, %v338_v18  ;;  %v361_v41 = vpop.f32.mrf.mxu2 }
  0xb8   : > { %v1760_v44 = vpop.eup %1399  ;;  %1409 = vrcp.f32 %v1749_v34  ;;  %v1022_v45 = vmul.f32 %v1679_v49, %v778_v8  ;;  %v362_v42 = vadd.f32 %v1604_v36, %v361_v41  ;;  %v385_v47 = vpop.f32.mrf.mxu3  ;;  %v887_v48 = vsub.f32 1.0, %v886_v31 }
  0xb9   : > { %1411 = vrcp.f32 %v1756_v39  ;;  %v386_v50 = vadd.f32 %v1604_v36, %v385_v47  ;;  %vm890_vm14 = vweird.f32 %v1630_v12  ;;  %vm891_vm15 = vweird.f32 %v1673_v46  ;;  %v316_v37 = vpop.f32.mrf.mxu0 }
  0xba   : > { %v1769_v52 = vpop.eup %1401  ;;  %1413 = vpow2.f32 %v1317_v17  ;;  %v1087_v53 = vsel %vm1038_vm6, %v1022_v45, 0.0  ;;  %v1318_v54 = vmul.f32 -1.442695, %v362_v42  ;;  %v888_v55 = vmul.f32 %v1673_v46, %v887_v48  ;;  %vm892_vm1 = vmor %vm890_vm14, %vm891_vm15  ;;  %v340_v42 = vpop.f32.mrf.mxu1 }
  0xbb   : > { %v1773_v57 = vpop.eup %1403  ;;  %1415 = vpow2.f32 %v1325_v23  ;;  %1088 = vadd.xlane.f32.xlu1 %v1087_v53  ;;  %v1326_v59 = vmul.f32 -1.442695, %v386_v50  ;;  %v894_v56 = vand.u32 2147483647, %v1630_v12  ;;  %v896_v60 = vand.u32 2147483648, %v1630_v12 }
  0xbc   : > { %v1406_v61 = vpop.eup %1405  ;;  %1417 = vpow2.f32 %v1310_v40  ;;  %v889_v63 = vadd.f32 %v1673_v46, %v888_v55  ;;  %v901_v0 = vmul.f32 %v1753_v38, %v1707_v62  ;;  %vm905_vm0 = vweird.f32 %v1707_v62 }
  0xbd   : > { %v1781_v1 = vpop.eup %1407  ;;  %v1783_v3 = vadd.f32 1.0, %v1406_v61  ;;  %1419 = vpow2.f32 %v1318_v54  ;;  %vm895_vm2 = vcmp.eq.f32.partialorder %v894_v56, 8.507059e+37  ;;  %v897_v4 = vor.u32 1.1754944e-38, %v896_v60 }
  0xbe   : > { %v1789_v5 = vpop.eup %1409  ;;  %1421 = vpow2.f32 %v1326_v59  ;;  %v893_v6 = vsel %vm892_vm1, %v1673_v46, %v889_v63  ;;  %v902_v7 = vsub.f32 1.0, %v901_v0  ;;  %vm906_vm3 = vweird.f32 %v1753_v38 }
  0xbf   : > { %v1793_v9 = vpop.eup %1411  ;;  %1423 = vrcp.f32 %v1783_v3  ;;  %v898_v10 = vsel %vm895_vm2, %v897_v4, %v893_v6  ;;  %v909_v11 = vand.u32 2147483647, %v1707_v62  ;;  %v911_v12 = vand.u32 2147483648, %v1707_v62  ;;  %vm907_vm8 = vmor %vm905_vm0, %vm906_vm3  ;;  %v364_v47 = vpop.f32.mrf.mxu2 }
  0xc0   : > { %v1414_v13 = vpop.eup %1413  ;;  %v1030_v15 = vmul.f32 %v1679_v49, %v898_v10  ;;  %v903_v17 = vmul.f32 %v1753_v38, %v902_v7  ;;  %v781_v46 = vmul.f32 %v1728_v21, %v1670_v43  ;;  %vm785_vm4 = vweird.f32 %v1670_v43 }
  0xc1   : > { %v1416_v20 = vpop.eup %1415  ;;  %v1803_v23 = vadd.f32 1.0, %v1414_v13  ;;  %vm1805_vm5 = vcmp.eq.f32.partialorder %v909_v11, 8.507059e+37  ;;  %v912_v19 = vor.u32 1.1754944e-38, %v911_v12  ;;  %vm786_vm7 = vweird.f32 %v1728_v21 }
  0xc2   : > { %v1418_v25 = vpop.eup %1417  ;;  %v1810_v26 = vadd.f32 1.0, %v1416_v20  ;;  %v1111_v28 = vsel %vm1038_vm6, %v1030_v15, 0.0  ;;  %v904_v29 = vadd.f32 %v1753_v38, %v903_v17  ;;  %v782_v30 = vsub.f32 1.0, %v781_v46  ;;  %vm787_vm10 = vmor %vm785_vm4, %vm786_vm7 }
  0xc3   : > { %v1420_v18 = vpop.eup %1419  ;;  %1425 = vrcp.f32 %v1803_v23  ;;  %v1815_v31 = vadd.f32 1.0, %v1418_v25  ;;  %1112 = vadd.xlane.f32.xlu0 %v1111_v28  ;;  %v789_v33 = vand.u32 2147483647, %v1670_v43  ;;  %v791_v35 = vand.u32 2147483648, %v1670_v43 }
  0xc4   : > { %v1422_v8 = vpop.eup %1421  ;;  %1427 = vrcp.f32 %v1810_v26  ;;  %v1824_v40 = vadd.f32 1.0, %v1420_v18  ;;  %v908_v41 = vsel %vm907_vm8, %v1753_v38, %v904_v29  ;;  %v783_v45 = vmul.f32 %v1728_v21, %v782_v30 }
  0xc5   : > { %v1828_v48 = vpop.eup %1423  ;;  %1429 = vrcp.f32 %v1815_v31  ;;  %v1831_v62 = vadd.f32 1.0, %v1422_v8  ;;  %v913_v50 = vsel %vm1805_vm5, %v912_v19, %v908_v41  ;;  %vm1835_vm9 = vcmp.eq.f32.partialorder %v789_v33, 8.507059e+37 }
  0xc6   : > { %1431 = vrcp.f32 %v1824_v40  ;;  %v1031_v38 = vmul.f32 %v1679_v49, %v913_v50  ;;  %v784_v54 = vadd.f32 %v1728_v21, %v783_v45  ;;  %v792_v55 = vor.u32 1.1754944e-38, %v791_v35  ;;  %v319_v45 = vpop.f32.mrf.mxu0 }
  0xc7   : > { %1433 = vrcp.f32 %v1831_v62  ;;  %v317_v59 = vadd.f32 %v1604_v36, %v316_v37  ;;  %v341_v56 = vadd.f32 %v1604_v36, %v340_v42  ;;  %v365_v60 = vadd.f32 %v1604_v36, %v364_v47 }
  0xc8   : > { %v1114_v61 = vsel %vm1038_vm6, %v1031_v38, 0.0  ;;  %v788_v63 = vsel %vm787_vm10, %v1728_v21, %v784_v54  ;;  %v541_v0 = vmul.f32 %v1683_v51, %v1637_v16  ;;  %vm545_vm11 = vweird.f32 %v1637_v16  ;;  %v343_v38 = vpop.f32.mrf.mxu1 }
  0xc9   : > { %v1855_v4 = vpop.eup %1425  ;;  %1115 = vadd.xlane.f32.xlu1 %v1114_v61  ;;  %v793_v43 = vsel %vm1835_vm9, %v792_v55, %v788_v63  ;;  %v1303_v6 = vmul.f32 -1.442695, %v317_v59  ;;  %v1311_v7 = vmul.f32 -1.442695, %v341_v56  ;;  %v1319_v10 = vmul.f32 -1.442695, %v365_v60 }
  0xca   : > { %v1859_v11 = vpop.eup %1427  ;;  %v1023_v12 = vmul.f32 %v1679_v49, %v793_v43  ;;  %v542_v13 = vsub.f32 1.0, %v541_v0  ;;  %vm546_vm12 = vweird.f32 %v1683_v51  ;;  %v549_v21 = vand.u32 2147483647, %v1637_v16 }
  0xcb   : > { %v1864_v15 = vpop.eup %1429  ;;  %1435 = vpow2.f32 %v1303_v6  ;;  %v551_v17 = vand.u32 2147483648, %v1637_v16  ;;  %v916_v46 = vmul.f32 %v1781_v1, %v1739_v32  ;;  %vm920_vm13 = vweird.f32 %v1739_v32  ;;  %vm547_vm0 = vmor %vm545_vm11, %vm546_vm12 }
  0xcc   : > { %v1870_v20 = vpop.eup %1431  ;;  %v1090_v24 = vsel %vm1038_vm6, %v1023_v12, 0.0  ;;  %1437 = vpow2.f32 %v1311_v7  ;;  %v543_v19 = vmul.f32 %v1683_v51, %v542_v13  ;;  %vm1874_vm14 = vcmp.eq.f32.partialorder %v549_v21, 8.507059e+37  ;;  %v367_v13 = vpop.f32.mrf.mxu2 }
  0xcd   : > { %v1878_v28 = vpop.eup %1433  ;;  %1091 = vadd.xlane.f32.xlu2 %v1090_v24  ;;  %1439 = vpow2.f32 %v1319_v10  ;;  %v552_v29 = vor.u32 1.1754944e-38, %v551_v17  ;;  %v917_v30 = vsub.f32 1.0, %v916_v46  ;;  %vm921_vm15 = vweird.f32 %v1781_v1  ;;  %v388_v21 = vpop.f32.mrf.mxu3 }
  0xce   : > { %v544_v18 = vadd.f32 %v1683_v51, %v543_v19  ;;  %v924_v33 = vand.u32 2147483647, %v1739_v32  ;;  %v926_v35 = vand.u32 2147483648, %v1739_v32  ;;  %v556_v37 = vmul.f32 %v1760_v44, %v1714_v2  ;;  %vm922_vm5 = vmor %vm920_vm13, %vm921_vm15 }
  0xcf   : > { %v918_v8 = vmul.f32 %v1781_v1, %v917_v30  ;;  %vm560_vm1 = vweird.f32 %v1714_v2  ;;  %vm561_vm2 = vweird.f32 %v1760_v44  ;;  %v564_v41 = vand.u32 2147483647, %v1714_v2 }
  0xd0   : > { %v548_v42 = vsel %vm547_vm0, %v1683_v51, %v544_v18  ;;  %vm1895_vm3 = vcmp.eq.f32.partialorder %v924_v33, 8.507059e+37  ;;  %v927_v50 = vor.u32 1.1754944e-38, %v926_v35  ;;  %v557_v53 = vsub.f32 1.0, %v556_v37  ;;  %vm562_vm7 = vmor %vm560_vm1, %vm561_vm2 }
  0xd1   : > { %v1436_v16 = vpop.eup %1435  ;;  %v553_v54 = vsel %vm1874_vm14, %v552_v29, %v548_v42  ;;  %v919_v55 = vadd.f32 %v1781_v1, %v918_v8  ;;  %vm1902_vm4 = vcmp.eq.f32.partialorder %v564_v41, 8.507059e+37  ;;  %v566_v56 = vand.u32 2147483648, %v1714_v2 }
  0xd2   : > { %v1438_v51 = vpop.eup %1437  ;;  %v1907_v60 = vadd.f32 1.0, %v1436_v16  ;;  %v1007_v61 = vmul.f32 %v1679_v49, %v553_v54  ;;  %v558_v63 = vmul.f32 %v1760_v44, %v557_v53  ;;  %v320_v0 = vadd.f32 %v1604_v36, %v319_v45 }
  0xd3   : > { %v1440_v43 = vpop.eup %1439  ;;  %v1916_v6 = vadd.f32 1.0, %v1438_v51  ;;  %v923_v7 = vsel %vm922_vm5, %v1781_v1, %v919_v55  ;;  %v567_v10 = vor.u32 1.1754944e-38, %v566_v56  ;;  %v344_v12 = vadd.f32 %v1604_v36, %v343_v38 }
  0xd4   : > { %1441 = vrcp.f32 %v1907_v60  ;;  %v1921_v17 = vadd.f32 1.0, %v1440_v43  ;;  %v1042_v32 = vsel %vm1038_vm6, %v1007_v61, 0.0  ;;  %v928_v46 = vsel %vm1895_vm3, %v927_v50, %v923_v7 }
  0xd5   : > { %1443 = vrcp.f32 %v1916_v6  ;;  %1043 = vadd.xlane.f32.xlu0 %v1042_v32  ;;  %v1032_v24 = vmul.f32 %v1679_v49, %v928_v46  ;;  %v559_v1 = vadd.f32 %v1760_v44, %v558_v63  ;;  %v1304_v19 = vmul.f32 -1.442695, %v320_v0 }
  0xd6   : > { %1445 = vrcp.f32 %v1921_v17  ;;  %v1312_v25 = vmul.f32 -1.442695, %v344_v12  ;;  %v368_v29 = vadd.f32 %v1604_v36, %v367_v13  ;;  %v389_v30 = vadd.f32 %v1604_v36, %v388_v21 }
  0xd7   : > { %v1117_v18 = vsel %vm1038_vm6, %v1032_v24, 0.0  ;;  %v563_v33 = vsel %vm562_vm7, %v1760_v44, %v559_v1  ;;  %1447 = vpow2.f32 %v1304_v19  ;;  %v661_v35 = vmul.f32 %v1712_v58, %v1656_v27 }
  0xd8   : > { %1118 = vadd.xlane.f32.xlu2 %v1117_v18  ;;  %v568_v37 = vsel %vm1902_vm4, %v567_v10, %v563_v33  ;;  %1449 = vpow2.f32 %v1312_v25  ;;  %v1320_v2 = vmul.f32 -1.442695, %v368_v29  ;;  %v1327_v8 = vmul.f32 -1.442695, %v389_v30  ;;  %v322_v33 = vpop.f32.mrf.mxu0 }
  0xd9   : > { %v1008_v41 = vmul.f32 %v1679_v49, %v568_v37  ;;  %v662_v45 = vsub.f32 1.0, %v661_v35  ;;  %vm665_vm8 = vweird.f32 %v1656_v27  ;;  %vm666_vm9 = vweird.f32 %v1712_v58  ;;  %v346_v35 = vpop.f32.mrf.mxu1 }
  0xda   : > { %v1945_v42 = vpop.eup %1441  ;;  %1451 = vpow2.f32 %v1320_v2  ;;  %v669_v44 = vand.u32 2147483647, %v1656_v27  ;;  %v671_v47 = vand.u32 2147483648, %v1656_v27  ;;  %v691_v50 = vmul.f32 %v1793_v9, %v1756_v39  ;;  %vm1958_vm11 = vmor %vm665_vm8, %vm666_vm9 }
  0xdb   : > { %v1951_v53 = vpop.eup %1443  ;;  %v1045_v38 = vsel %vm1038_vm6, %v1008_v41, 0.0  ;;  %1453 = vpow2.f32 %v1327_v8  ;;  %v663_v16 = vmul.f32 %v1712_v58, %v662_v45  ;;  %vm695_vm10 = vweird.f32 %v1756_v39  ;;  %v370_v45 = vpop.f32.mrf.mxu2 }
  0xdc   : > { %v1956_v54 = vpop.eup %1445  ;;  %1046 = vadd.xlane.f32.xlu1 %v1045_v38  ;;  %vm1962_vm12 = vcmp.eq.f32.partialorder %v669_v44, 8.507059e+37  ;;  %v672_v59 = vor.u32 1.1754944e-38, %v671_v47  ;;  %v692_v56 = vsub.f32 1.0, %v691_v50  ;;  %vm696_vm13 = vweird.f32 %v1793_v9  ;;  %v391_v44 = vpop.f32.mrf.mxu3 }
  0xdd   : > { %v1448_v51 = vpop.eup %1447  ;;  %v664_v61 = vadd.f32 %v1712_v58, %v663_v16  ;;  %v699_v63 = vand.u32 2147483647, %v1756_v39  ;;  %v701_v0 = vand.u32 2147483648, %v1756_v39  ;;  %v676_v43 = vmul.f32 %v1769_v52, %v1725_v14  ;;  %vm1984_vm0 = vmor %vm695_vm10, %vm696_vm13 }
  0xde   : > { %v1450_v7 = vpop.eup %1449  ;;  %v1972_v10 = vadd.f32 1.0, %v1448_v51  ;;  %v693_v12 = vmul.f32 %v1793_v9, %v692_v56  ;;  %vm680_vm14 = vweird.f32 %v1725_v14  ;;  %vm681_vm15 = vweird.f32 %v1769_v52 }
  0xdf   : > { %v1977_v13 = vadd.f32 1.0, %v1450_v7  ;;  %v668_v21 = vsel %vm1958_vm11, %v1712_v58, %v664_v61  ;;  %vm1988_vm1 = vcmp.eq.f32.partialorder %v699_v63, 8.507059e+37  ;;  %v702_v24 = vor.u32 1.1754944e-38, %v701_v0  ;;  %vm2016_vm2 = vmor %vm680_vm14, %vm681_vm15 }
  0xe0   : > { %v1452_v1 = vpop.eup %1451  ;;  %1455 = vrcp.f32 %v1972_v10  ;;  %v673_v19 = vsel %vm1962_vm12, %v672_v59, %v668_v21  ;;  %v694_v25 = vadd.f32 %v1793_v9, %v693_v12  ;;  %v677_v58 = vsub.f32 1.0, %v676_v43 }
  0xe1   : > { %v1454_v29 = vpop.eup %1453  ;;  %1457 = vrcp.f32 %v1977_v13  ;;  %v1997_v39 = vadd.f32 1.0, %v1452_v1  ;;  %v1015_v30 = vmul.f32 %v1679_v49, %v673_v19  ;;  %v684_v18 = vand.u32 2147483647, %v1725_v14 }
  0xe2   : > { %v2001_v37 = vadd.f32 1.0, %v1454_v29  ;;  %v698_v2 = vsel %vm1984_vm0, %v1793_v9, %v694_v25  ;;  %v678_v8 = vmul.f32 %v1769_v52, %v677_v58  ;;  %v686_v41 = vand.u32 2147483648, %v1725_v14 }
  0xe3   : > { %1459 = vrcp.f32 %v1997_v39  ;;  %v1066_v47 = vsel %vm1038_vm6, %v1015_v30, 0.0  ;;  %v703_v50 = vsel %vm1988_vm1, %v702_v24, %v698_v2  ;;  %vm2020_vm3 = vcmp.eq.f32.partialorder %v684_v18, 8.507059e+37 }
  0xe4   : > { %1461 = vrcp.f32 %v2001_v37  ;;  %1067 = vadd.xlane.f32.xlu0 %v1066_v47  ;;  %v1017_v16 = vmul.f32 %v1679_v49, %v703_v50  ;;  %v679_v55 = vadd.f32 %v1769_v52, %v678_v8  ;;  %v687_v27 = vor.u32 1.1754944e-38, %v686_v41 }
  0xe5   : > { %v323_v59 = vadd.f32 %v1604_v36, %v322_v33  ;;  %v347_v14 = vadd.f32 %v1604_v36, %v346_v35  ;;  %v371_v56 = vadd.f32 %v1604_v36, %v370_v45  ;;  %v392_v51 = vadd.f32 %v1604_v36, %v391_v44 }
  0xe6   : > { %v2031_v61 = vpop.eup %1455  ;;  %v1072_v63 = vsel %vm1038_vm6, %v1017_v16, 0.0  ;;  %v683_v0 = vsel %vm2016_vm2, %v1769_v52, %v679_v55  ;;  %v796_v43 = vmul.f32 %v1773_v57, %v1730_v22  ;;  %vm800_vm4 = vweird.f32 %v1730_v22 }
  0xe7   : > { %v2040_v7 = vpop.eup %1457  ;;  %1073 = vadd.xlane.f32.xlu2 %v1072_v63  ;;  %v688_v12 = vsel %vm2020_vm3, %v687_v27, %v683_v0  ;;  %v1305_v21 = vmul.f32 -1.442695, %v323_v59  ;;  %v1313_v32 = vmul.f32 -1.442695, %v347_v14  ;;  %v1321_v46 = vmul.f32 -1.442695, %v371_v56  ;;  %v394_v27 = vpop.f32.mrf.mxu3 }
  0xe8   : > { %v1016_v24 = vmul.f32 %v1679_v49, %v688_v12  ;;  %v1328_v1 = vmul.f32 -1.442695, %v392_v51  ;;  %v797_v19 = vsub.f32 1.0, %v796_v43  ;;  %vm801_vm5 = vweird.f32 %v1773_v57 }
  0xe9   : > { %v2046_v52 = vpop.eup %1459  ;;  %1463 = vpow2.f32 %v1305_v21  ;;  %v804_v25 = vand.u32 2147483647, %v1730_v22  ;;  %v806_v58 = vand.u32 2147483648, %v1730_v22  ;;  %v586_v29 = vmul.f32 %v1828_v48, %v1783_v3  ;;  %vm2059_vm8 = vmor %vm800_vm4, %vm801_vm5 }
  0xea   : > { %v2052_v30 = vpop.eup %1461  ;;  %v1069_v18 = vsel %vm1038_vm6, %v1016_v24, 0.0  ;;  %1465 = vpow2.f32 %v1313_v32  ;;  %v798_v33 = vmul.f32 %v1773_v57, %v797_v19  ;;  %vm590_vm7 = vweird.f32 %v1783_v3 }
  0xeb   : > { %1070 = vadd.xlane.f32.xlu1 %v1069_v18  ;;  %1467 = vpow2.f32 %v1321_v46  ;;  %vm2063_vm9 = vcmp.eq.f32.partialorder %v804_v25, 8.507059e+37  ;;  %v807_v8 = vor.u32 1.1754944e-38, %v806_v58  ;;  %v587_v41 = vsub.f32 1.0, %v586_v29 }
  0xec   : > { %1469 = vpow2.f32 %v1328_v1  ;;  %v799_v45 = vadd.f32 %v1773_v57, %v798_v33  ;;  %vm591_vm10 = vweird.f32 %v1828_v48  ;;  %v594_v44 = vand.u32 2147483647, %v1783_v3 }
  0xed   : > { %v588_v47 = vmul.f32 %v1828_v48, %v587_v41  ;;  %v596_v22 = vand.u32 2147483648, %v1783_v3  ;;  %v571_v50 = vmul.f32 %v1789_v5, %v1749_v34  ;;  %vm575_vm11 = vweird.f32 %v1749_v34  ;;  %vm2080_vm12 = vmor %vm590_vm7, %vm591_vm10 }
  0xee   : > { %v803_v38 = vsel %vm2059_vm8, %v1773_v57, %v799_v45  ;;  %vm2084_vm13 = vcmp.eq.f32.partialorder %v594_v44, 8.507059e+37  ;;  %vm576_vm14 = vweird.f32 %v1789_v5  ;;  %v579_v55 = vand.u32 2147483647, %v1749_v34 }
  0xef   : > { %v1464_v59 = vpop.eup %1463  ;;  %v808_v14 = vsel %vm2063_vm9, %v807_v8, %v803_v38  ;;  %v589_v57 = vadd.f32 %v1828_v48, %v588_v47  ;;  %v597_v3 = vor.u32 1.1754944e-38, %v596_v22  ;;  %v572_v56 = vsub.f32 1.0, %v571_v50  ;;  %vm2118_vm0 = vmor %vm575_vm11, %vm576_vm14 }
  0xf0   : > { %v1466_v51 = vpop.eup %1465  ;;  %v2093_v63 = vadd.f32 1.0, %v1464_v59  ;;  %v1024_v0 = vmul.f32 %v1679_v49, %v808_v14  ;;  %vm2096_vm15 = vcmp.eq.f32.partialorder %v579_v55, 8.507059e+37  ;;  %v581_v12 = vand.u32 2147483648, %v1749_v34 }
  0xf1   : > { %v1468_v21 = vpop.eup %1467  ;;  %v2101_v32 = vadd.f32 1.0, %v1466_v51  ;;  %v593_v46 = vsel %vm2080_vm12, %v1828_v48, %v589_v57  ;;  %v573_v24 = vmul.f32 %v1789_v5, %v572_v56  ;;  %v395_v1 = vadd.f32 %v1604_v36, %v394_v27 }
  0xf2   : > { %v1470_v19 = vpop.eup %1469  ;;  %1471 = vrcp.f32 %v2093_v63  ;;  %v2109_v25 = vadd.f32 1.0, %v1468_v21  ;;  %v1093_v58 = vsel %vm1038_vm6, %v1024_v0, 0.0  ;;  %v598_v29 = vsel %vm2084_vm13, %v597_v3, %v593_v46 }
  0xf3   : > { %1473 = vrcp.f32 %v2101_v32  ;;  %v2123_v36 = vadd.f32 1.0, %v1470_v19  ;;  %1094 = vadd.xlane.f32.xlu0 %v1093_v58  ;;  %v1010_v18 = vmul.f32 %v1679_v49, %v598_v29  ;;  %v574_v33 = vadd.f32 %v1789_v5, %v573_v24 }
  0xf4   : > { %1475 = vrcp.f32 %v2109_v25  ;;  %v582_v35 = vor.u32 1.1754944e-38, %v581_v12  ;;  %v1329_v2 = vmul.f32 -1.442695, %v395_v1  ;;  %v931_v34 = vmul.f32 %v1859_v11, %v1810_v26 }
  0xf5   : > { %1477 = vrcp.f32 %v2123_v36  ;;  %v1051_v8 = vsel %vm1038_vm6, %v1010_v18, 0.0  ;;  %v578_v41 = vsel %vm2118_vm0, %v1789_v5, %v574_v33  ;;  %vm935_vm1 = vweird.f32 %v1810_v26 }
  0xf6   : > { %1052 = vadd.xlane.f32.xlu2 %v1051_v8  ;;  %v583_v45 = vsel %vm2096_vm15, %v582_v35, %v578_v41  ;;  %1479 = vpow2.f32 %v1329_v2  ;;  %v932_v44 = vsub.f32 1.0, %v931_v34  ;;  %vm936_vm2 = vweird.f32 %v1859_v11 }
  0xf7   : > { %v1009_v47 = vmul.f32 %v1679_v49, %v583_v45  ;;  %v939_v22 = vand.u32 2147483647, %v1810_v26  ;;  %v941_v50 = vand.u32 2147483648, %v1810_v26  ;;  %v826_v38 = vmul.f32 %v1870_v20, %v1824_v40  ;;  %vm2155_vm5 = vmor %vm935_vm1, %vm936_vm2 }
  0xf8   : > { %v2144_v5 = vpop.eup %1471  ;;  %v933_v9 = vmul.f32 %v1859_v11, %v932_v44  ;;  %vm830_vm3 = vweird.f32 %v1824_v40  ;;  %vm831_vm4 = vweird.f32 %v1870_v20  ;;  %v834_v16 = vand.u32 2147483647, %v1824_v40 }
  0xf9   : > { %v2150_v55 = vpop.eup %1473  ;;  %v1048_v27 = vsel %vm1038_vm6, %v1009_v47, 0.0  ;;  %vm2159_vm7 = vcmp.eq.f32.partialorder %v939_v22, 8.507059e+37  ;;  %v942_v57 = vor.u32 1.1754944e-38, %v941_v50  ;;  %v827_v3 = vsub.f32 1.0, %v826_v38  ;;  %vm2186_vm11 = vmor %vm830_vm3, %vm831_vm4 }
  0xfa   : > { %v2163_v56 = vpop.eup %1475  ;;  %1049 = vadd.xlane.f32.xlu1 %v1048_v27  ;;  %v934_v51 = vadd.f32 %v1859_v11, %v933_v9  ;;  %vm2166_vm8 = vcmp.eq.f32.partialorder %v834_v16, 8.507059e+37  ;;  %v836_v26 = vand.u32 2147483648, %v1824_v40  ;;  %v811_v43 = vmul.f32 %v1855_v4, %v1803_v23 }
  0xfb   : > { %v2173_v12 = vpop.eup %1477  ;;  %v828_v21 = vmul.f32 %v1870_v20, %v827_v3  ;;  %vm815_vm9 = vweird.f32 %v1803_v23  ;;  %vm816_vm10 = vweird.f32 %v1855_v4  ;;  %v819_v46 = vand.u32 2147483647, %v1803_v23 }
  0xfc   : > { %v1480_v24 = vpop.eup %1479  ;;  %v938_v1 = vsel %vm2155_vm5, %v1859_v11, %v934_v51  ;;  %v837_v58 = vor.u32 1.1754944e-38, %v836_v26  ;;  %v812_v29 = vsub.f32 1.0, %v811_v43  ;;  %v821_v48 = vand.u32 2147483648, %v1803_v23  ;;  %vm2212_vm13 = vmor %vm815_vm9, %vm816_vm10 }
  0xfd   : > { %v2191_v18 = vadd.f32 1.0, %v1480_v24  ;;  %v943_v33 = vsel %vm2159_vm7, %v942_v57, %v938_v1  ;;  %v829_v35 = vadd.f32 %v1870_v20, %v828_v21  ;;  %vm2196_vm12 = vcmp.eq.f32.partialorder %v819_v46, 8.507059e+37 }
  0xfe   : > { %v1033_v40 = vmul.f32 %v1679_v49, %v943_v33  ;;  %v813_v2 = vmul.f32 %v1855_v4, %v812_v29  ;;  %v822_v34 = vor.u32 1.1754944e-38, %v821_v48  ;;  %v706_v8 = vmul.f32 %v1864_v15, %v1815_v31 }
  0xff   : > { %1481 = vrcp.f32 %v2191_v18  ;;  %v833_v41 = vsel %vm2186_vm11, %v1870_v20, %v829_v35  ;;  %vm710_vm14 = vweird.f32 %v1815_v31  ;;  %vm711_vm15 = vweird.f32 %v1864_v15 }
 0x100   : > { %v1120_v44 = vsel %vm1038_vm6, %v1033_v40, 0.0  ;;  %v838_v47 = vsel %vm2166_vm8, %v837_v58, %v833_v41  ;;  %v814_v22 = vadd.f32 %v1855_v4, %v813_v2  ;;  %v707_v20 = vsub.f32 1.0, %v706_v8  ;;  %vm2240_vm2 = vmor %vm710_vm14, %vm711_vm15 }
 0x101   : > { %1121 = vadd.xlane.f32.xlu0 %v1120_v44  ;;  %v1026_v50 = vmul.f32 %v1679_v49, %v838_v47  ;;  %v714_v23 = vand.u32 2147483647, %v1815_v31  ;;  %v716_v38 = vand.u32 2147483648, %v1815_v31  ;;  %v601_v9 = vmul.f32 %v1945_v42, %v1907_v60 }
 0x102   : > { %v818_v16 = vsel %vm2212_vm13, %v1855_v4, %v814_v22  ;;  %v708_v27 = vmul.f32 %v1864_v15, %v707_v20  ;;  %vm605_vm0 = vweird.f32 %v1907_v60  ;;  %vm606_vm1 = vweird.f32 %v1945_v42 }
 0x103   : > { %v1099_v59 = vsel %vm1038_vm6, %v1026_v50, 0.0  ;;  %v823_v14 = vsel %vm2196_vm12, %v822_v34, %v818_v16  ;;  %vm2244_vm3 = vcmp.eq.f32.partialorder %v714_v23, 8.507059e+37  ;;  %v717_v3 = vor.u32 1.1754944e-38, %v716_v38  ;;  %vm2273_vm8 = vmor %vm605_vm0, %vm606_vm1 }
 0x104   : > { %1100 = vadd.xlane.f32.xlu2 %v1099_v59  ;;  %v1025_v51 = vmul.f32 %v1679_v49, %v823_v14  ;;  %v709_v0 = vadd.f32 %v1864_v15, %v708_v27  ;;  %v602_v26 = vsub.f32 1.0, %v601_v9  ;;  %v609_v43 = vand.u32 2147483647, %v1907_v60 }
 0x105   : > { %v2251_v21 = vpop.eup %1481  ;;  %v611_v31 = vand.u32 2147483648, %v1907_v60  ;;  %v946_v46 = vmul.f32 %v1878_v28, %v1831_v62  ;;  %vm950_vm4 = vweird.f32 %v1831_v62  ;;  %vm951_vm5 = vweird.f32 %v1878_v28 }
 0x106   : > { %v1096_v24 = vsel %vm1038_vm6, %v1025_v51, 0.0  ;;  %v713_v1 = vsel %vm2240_vm2, %v1864_v15, %v709_v0  ;;  %v603_v19 = vmul.f32 %v1945_v42, %v602_v26  ;;  %vm2263_vm7 = vcmp.eq.f32.partialorder %v609_v43, 8.507059e+37  ;;  %vm2298_vm12 = vmor %vm950_vm4, %vm951_vm5 }
 0x107   : > { %1097 = vadd.xlane.f32.xlu1 %v1096_v24  ;;  %v718_v29 = vsel %vm2244_vm3, %v717_v3, %v713_v1  ;;  %v612_v33 = vor.u32 1.1754944e-38, %v611_v31  ;;  %v947_v15 = vsub.f32 1.0, %v946_v46  ;;  %v954_v35 = vand.u32 2147483647, %v1831_v62 }
 0x108   : > { %v1018_v11 = vmul.f32 %v1679_v49, %v718_v29  ;;  %v604_v40 = vadd.f32 %v1945_v42, %v603_v19  ;;  %v956_v2 = vand.u32 2147483648, %v1831_v62  ;;  %v841_v34 = vmul.f32 %v1956_v54, %v1921_v17  ;;  %v2361_v19 = vld [vmem:[%s2712_s1 + $0x21] ss:$0 sm:$0xff] }
 0x109   : > { %v948_v8 = vmul.f32 %v1878_v28, %v947_v15  ;;  %vm2284_vm9 = vcmp.eq.f32.partialorder %v954_v35, 8.507059e+37  ;;  %vm845_vm10 = vweird.f32 %v1921_v17  ;;  %vm846_vm11 = vweird.f32 %v1956_v54 }
 0x10a   : > { %v1075_v41 = vsel %vm1038_vm6, %v1018_v11, 0.0  ;;  %v608_v45 = vsel %vm2273_vm8, %v1945_v42, %v604_v40  ;;  %v957_v47 = vor.u32 1.1754944e-38, %v956_v2  ;;  %v842_v22 = vsub.f32 1.0, %v841_v34  ;;  %vm2319_vm14 = vmor %vm845_vm10, %vm846_vm11 }
 0x10b   : > { %1076 = vadd.xlane.f32.xlu0 %v1075_v41  ;;  %v613_v20 = vsel %vm2263_vm7, %v612_v33, %v608_v45  ;;  %v949_v50 = vadd.f32 %v1878_v28, %v948_v8  ;;  %v849_v23 = vand.u32 2147483647, %v1921_v17  ;;  %v851_v42 = vand.u32 2147483648, %v1921_v17 }
 0x10c   : > { %v1011_v38 = vmul.f32 %v1679_v49, %v613_v20  ;;  %v843_v62 = vmul.f32 %v1956_v54, %v842_v22  ;;  %v736_v9 = vmul.f32 %v2040_v7, %v1977_v13  ;;  %vm740_vm13 = vweird.f32 %v1977_v13 }
 0x10d   : > { %v953_v16 = vsel %vm2298_vm12, %v1878_v28, %v949_v50  ;;  %vm2323_vm15 = vcmp.eq.f32.partialorder %v849_v23, 8.507059e+37  ;;  %v852_v14 = vor.u32 1.1754944e-38, %v851_v42  ;;  %vm741_vm0 = vweird.f32 %v2040_v7 }
 0x10e   : > { %v1054_v57 = vsel %vm1038_vm6, %v1011_v38, 0.0  ;;  %v958_v28 = vsel %vm2284_vm9, %v957_v47, %v953_v16  ;;  %v844_v4 = vadd.f32 %v1956_v54, %v843_v62  ;;  %v737_v3 = vsub.f32 1.0, %v736_v9  ;;  %vm2350_vm3 = vmor %vm740_vm13, %vm741_vm0 }
 0x10f   : > { %1055 = vadd.xlane.f32.xlu2 %v1054_v57  ;;  %v1034_v17 = vmul.f32 %v1679_v49, %v958_v28  ;;  %v744_v51 = vand.u32 2147483647, %v1977_v13  ;;  %v746_v0 = vand.u32 2147483648, %v1977_v13  ;;  %v721_v26 = vmul.f32 %v1951_v53, %v1916_v6 }
 0x110   : > { %v848_v43 = vsel %vm2319_vm14, %v1956_v54, %v844_v4  ;;  %v738_v31 = vmul.f32 %v2040_v7, %v737_v3  ;;  %vm725_vm1 = vweird.f32 %v1916_v6  ;;  %vm726_vm2 = vweird.f32 %v1951_v53 }
 0x111   : > { %v1123_v46 = vsel %vm1038_vm6, %v1034_v17, 0.0  ;;  %v853_v49 = vsel %vm2323_vm15, %v852_v14, %v848_v43  ;;  %vm2354_vm4 = vcmp.eq.f32.partialorder %v744_v51, 8.507059e+37  ;;  %v747_v1 = vor.u32 1.1754944e-38, %v746_v0  ;;  %vm2386_vm9 = vmor %vm725_vm1, %vm726_vm2 }
 0x112   : > { %1124 = vadd.xlane.f32.xlu1 %v1123_v46  ;;  %v1027_v58 = vmul.f32 %v2361_v19, %v853_v49  ;;  %v739_v29 = vadd.f32 %v2040_v7, %v738_v31  ;;  %v722_v13 = vsub.f32 1.0, %v721_v26  ;;  %v729_v48 = vand.u32 2147483647, %v1916_v6 }
 0x113   : > { %v731_v33 = vand.u32 2147483648, %v1916_v6  ;;  %v616_v15 = vmul.f32 %v2031_v61, %v1972_v10  ;;  %vm620_vm5 = vweird.f32 %v1972_v10  ;;  %vm621_vm7 = vweird.f32 %v2031_v61 }
 0x114   : > { %v1102_v35 = vsel %vm1038_vm6, %v1027_v58, 0.0  ;;  %v743_v11 = vsel %vm2350_vm3, %v2040_v7, %v739_v29  ;;  %v723_v40 = vmul.f32 %v1951_v53, %v722_v13  ;;  %vm2376_vm8 = vcmp.eq.f32.partialorder %v729_v48, 8.507059e+37  ;;  %vm2411_vm13 = vmor %vm620_vm5, %vm621_vm7 }
 0x115   : > { %1103 = vadd.xlane.f32.xlu0 %v1102_v35  ;;  %v748_v34 = vsel %vm2354_vm4, %v747_v1, %v743_v11  ;;  %v732_v60 = vor.u32 1.1754944e-38, %v731_v33  ;;  %v617_v7 = vsub.f32 1.0, %v616_v15  ;;  %v624_v41 = vand.u32 2147483647, %v1972_v10 }
 0x116   : > { %v1020_v45 = vmul.f32 %v2361_v19, %v748_v34  ;;  %v724_v44 = vadd.f32 %v1951_v53, %v723_v40  ;;  %v626_v47 = vand.u32 2147483648, %v1972_v10  ;;  %v871_v22 = vmul.f32 %v2163_v56, %v2109_v25 }
 0x117   : > { %v618_v20 = vmul.f32 %v2031_v61, %v617_v7  ;;  %vm2397_vm10 = vcmp.eq.f32.partialorder %v624_v41, 8.507059e+37  ;;  %vm875_vm11 = vweird.f32 %v2109_v25  ;;  %vm876_vm12 = vweird.f32 %v2163_v56 }
 0x118   : > { %v1081_v50 = vsel %vm1038_vm6, %v1020_v45, 0.0  ;;  %v728_v23 = vsel %vm2386_vm9, %v1951_v53, %v724_v44  ;;  %v627_v38 = vor.u32 1.1754944e-38, %v626_v47  ;;  %v872_v62 = vsub.f32 1.0, %v871_v22  ;;  %vm2432_vm15 = vmor %vm875_vm11, %vm876_vm12 }
 0x119   : > { %1082 = vadd.xlane.f32.xlu2 %v1081_v50  ;;  %v733_v9 = vsel %vm2376_vm8, %v732_v60, %v728_v23  ;;  %v619_v16 = vadd.f32 %v2031_v61, %v618_v20  ;;  %v879_v27 = vand.u32 2147483647, %v2109_v25  ;;  %v881_v53 = vand.u32 2147483648, %v2109_v25 }
 0x11a   : > { %v1019_v59 = vmul.f32 %v2361_v19, %v733_v9  ;;  %v873_v10 = vmul.f32 %v2163_v56, %v872_v62  ;;  %v856_v14 = vmul.f32 %v2046_v52, %v1997_v39  ;;  %vm860_vm14 = vweird.f32 %v1997_v39 }
 0x11b   : > { %v623_v57 = vsel %vm2411_vm13, %v2031_v61, %v619_v16  ;;  %vm2436_vm0 = vcmp.eq.f32.partialorder %v879_v27, 8.507059e+37  ;;  %v882_v3 = vor.u32 1.1754944e-38, %v881_v53  ;;  %vm861_vm1 = vweird.f32 %v2046_v52 }
 0x11c   : > { %v1078_v17 = vsel %vm1038_vm6, %v1019_v59, 0.0  ;;  %v628_v61 = vsel %vm2397_vm10, %v627_v38, %v623_v57  ;;  %v874_v51 = vadd.f32 %v2163_v56, %v873_v10  ;;  %v857_v0 = vsub.f32 1.0, %v856_v14  ;;  %vm2463_vm4 = vmor %vm860_vm14, %vm861_vm1 }
 0x11d   : > { %1079 = vadd.xlane.f32.xlu1 %v1078_v17  ;;  %v1012_v25 = vmul.f32 %v2361_v19, %v628_v61  ;;  %v864_v26 = vand.u32 2147483647, %v1997_v39  ;;  %v866_v43 = vand.u32 2147483648, %v1997_v39  ;;  %v751_v31 = vmul.f32 %v2150_v55, %v2101_v32 }
 0x11e   : > { %v878_v46 = vsel %vm2432_vm15, %v2163_v56, %v874_v51  ;;  %v858_v49 = vmul.f32 %v2046_v52, %v857_v0  ;;  %vm755_vm2 = vweird.f32 %v2101_v32  ;;  %vm756_vm3 = vweird.f32 %v2150_v55  ;;  %v2561_v51 = vld [vmem:[%s2712_s1 + $0x22] ss:$0 sm:$0xff] }
 0x11f   : > { %v1057_v24 = vsel %vm1038_vm6, %v1012_v25, 0.0  ;;  %v883_v54 = vsel %vm2436_vm0, %v882_v3, %v878_v46  ;;  %vm2467_vm5 = vcmp.eq.f32.partialorder %v864_v26, 8.507059e+37  ;;  %v867_v58 = vor.u32 1.1754944e-38, %v866_v43  ;;  %vm2494_vm10 = vmor %vm755_vm2, %vm756_vm3 }
 0x120   : > { %1058 = vadd.xlane.f32.xlu0 %v1057_v24  ;;  %v1029_v29 = vmul.f32 %v2361_v19, %v883_v54  ;;  %v859_v13 = vadd.f32 %v2046_v52, %v858_v49  ;;  %v752_v48 = vsub.f32 1.0, %v751_v31  ;;  %v759_v33 = vand.u32 2147483647, %v2101_v32 }
 0x121   : > { %v761_v15 = vand.u32 2147483648, %v2101_v32  ;;  %v961_v39 = vmul.f32 %v2052_v30, %v2001_v37  ;;  %vm965_vm7 = vweird.f32 %v2001_v37  ;;  %vm966_vm8 = vweird.f32 %v2052_v30 }
 0x122   : > { %v1108_v35 = vsel %vm1038_vm6, %v1029_v29, 0.0  ;;  %v863_v11 = vsel %vm2463_vm4, %v2046_v52, %v859_v13  ;;  %v753_v40 = vmul.f32 %v2150_v55, %v752_v48  ;;  %vm2484_vm9 = vcmp.eq.f32.partialorder %v759_v33, 8.507059e+37  ;;  %vm2519_vm14 = vmor %vm965_vm7, %vm966_vm8 }
 0x123   : > { %1109 = vadd.xlane.f32.xlu2 %v1108_v35  ;;  %v868_v34 = vsel %vm2467_vm5, %v867_v58, %v863_v11  ;;  %v762_v60 = vor.u32 1.1754944e-38, %v761_v15  ;;  %v962_v52 = vsub.f32 1.0, %v961_v39  ;;  %v969_v7 = vand.u32 2147483647, %v2001_v37 }
 0x124   : > { %v1028_v41 = vmul.f32 %v2361_v19, %v868_v34  ;;  %v754_v45 = vadd.f32 %v2150_v55, %v753_v40  ;;  %v971_v44 = vand.u32 2147483648, %v2001_v37  ;;  %v631_v47 = vmul.f32 %v2144_v5, %v2093_v63 }
 0x125   : > { %v963_v22 = vmul.f32 %v2052_v30, %v962_v52  ;;  %vm2505_vm11 = vcmp.eq.f32.partialorder %v969_v7, 8.507059e+37  ;;  %vm635_vm12 = vweird.f32 %v2093_v63  ;;  %vm636_vm13 = vweird.f32 %v2144_v5 }
 0x126   : > { %v1105_v20 = vsel %vm1038_vm6, %v1028_v41, 0.0  ;;  %v758_v6 = vsel %vm2494_vm10, %v2150_v55, %v754_v45  ;;  %v972_v23 = vor.u32 1.1754944e-38, %v971_v44  ;;  %v632_v42 = vsub.f32 1.0, %v631_v47  ;;  %vm2540_vm0 = vmor %vm635_vm12, %vm636_vm13 }
 0x127   : > { %1106 = vadd.xlane.f32.xlu1 %v1105_v20  ;;  %v763_v38 = vsel %vm2484_vm9, %v762_v60, %v758_v6  ;;  %v964_v62 = vadd.f32 %v2052_v30, %v963_v22  ;;  %v639_v9 = vand.u32 2147483647, %v2093_v63  ;;  %v641_v55 = vand.u32 2147483648, %v2093_v63  ;;  %v1041_v26 = vpop.xlane.xlu0 %1040 }
 0x128   : > { %v1021_v16 = vmul.f32 %v2361_v19, %v763_v38  ;;  %v633_v37 = vmul.f32 %v2144_v5, %v632_v42  ;;  %v976_v27 = vmul.f32 %v2173_v12, %v2123_v36  ;;  %vm980_vm15 = vweird.f32 %v2123_v36 }
 0x129   : > { %v968_v53 = vsel %vm2519_vm14, %v2052_v30, %v964_v62  ;;  %vm2544_vm1 = vcmp.eq.f32.partialorder %v639_v9, 8.507059e+37  ;;  %v642_v14 = vor.u32 1.1754944e-38, %v641_v55  ;;  %vm981_vm2 = vweird.f32 %v2173_v12 }
 0x12a   : > { %v1084_v57 = vsel %vm1038_vm6, %v1021_v16, 0.0  ;;  %v973_v30 = vsel %vm2505_vm11, %v972_v23, %v968_v53  ;;  %v634_v28 = vadd.f32 %v2144_v5, %v633_v37  ;;  %v977_v4 = vsub.f32 1.0, %v976_v27  ;;  %v1065_v43 = vpop.xlane.xlu2 %1064  ;;  %vm2576_vm5 = vmor %vm980_vm15, %vm981_vm2 }
 0x12b   : > { %1085 = vadd.xlane.f32.xlu0 %v1084_v57  ;;  %v1035_v63 = vmul.f32 %v2361_v19, %v973_v30  ;;  %v984_v3 = vand.u32 2147483647, %v2123_v36  ;;  %v986_v17 = vand.u32 2147483648, %v2123_v36  ;;  %v991_v61 = vmul.f32 %v2251_v21, %v2191_v18 }
 0x12c   : > { %v638_v0 = vsel %vm2540_vm0, %v2144_v5, %v634_v28  ;;  %v978_v25 = vmul.f32 %v2173_v12, %v977_v4  ;;  %vm995_vm3 = vweird.f32 %v2191_v18  ;;  %vm996_vm4 = vweird.f32 %v2251_v21 }
 0x12d   : > { %v1126_v31 = vsel %vm1038_vm6, %v1035_v63, 0.0  ;;  %v643_v46 = vsel %vm2544_vm1, %v642_v14, %v638_v0  ;;  %vm2580_vm7 = vcmp.eq.f32.partialorder %v984_v3, 8.507059e+37  ;;  %v987_v24 = vor.u32 1.1754944e-38, %v986_v17  ;;  %vm997_vm9 = vmor %vm995_vm3, %vm996_vm4 }
 0x12e   : > { %1127 = vadd.xlane.f32.xlu2 %v1126_v31  ;;  %v1013_v54 = vmul.f32 %v2361_v19, %v643_v46  ;;  %v979_v36 = vadd.f32 %v2173_v12, %v978_v25  ;;  %v992_v1 = vsub.f32 1.0, %v991_v61  ;;  %v999_v56 = vand.u32 2147483647, %v2191_v18  ;;  %v1089_v58 = vpop.xlane.xlu1 %1088 }
 0x12f   : > { %v1001_v29 = vand.u32 2147483648, %v2191_v18  ;;  %vm1168_vm8 = vcmask 7168   ;;  %v1136_v13 = vadd.f32 %v2561_v51, %v1041_v26  ;;  %v1144_v48 = vadd.f32 %v2561_v51, %v1065_v43 }
 0x130   : > { %v1060_v33 = vsel %vm1038_vm6, %v1013_v54, 0.0  ;;  %v983_v15 = vsel %vm2576_vm5, %v2173_v12, %v979_v36  ;;  %v993_v39 = vmul.f32 %v2251_v21, %v992_v1  ;;  %v1152_v40 = vadd.f32 %v2561_v51, %v1089_v58 }
 0x131   : > { %1061 = vadd.xlane.f32.xlu1 %v1060_v33  ;;  %v988_v35 = vsel %vm2580_vm7, %v987_v24, %v983_v15  ;;  %v1002_v11 = vor.u32 1.1754944e-38, %v1001_v29  ;;  %1169 = vst.msk [vmem:[%s2589_s6] sm:$0xff] %vm1168_vm8, %v1136_v13  ;;  %vm1000_vm10 = vcmp.eq.f32.partialorder %v999_v56, 8.507059e+37 }
 0x132   : > { %v1036_v2 = vmul.f32 %v2361_v19, %v988_v35  ;;  %v994_v12 = vadd.f32 %v2251_v21, %v993_v39  ;;  %1177 = vst.msk [vmem:[%s2589_s6 + $0x40] sm:$0xff] %vm1168_vm8, %v1144_v48 }
 0x133   : > { %1185 = vst.msk [vmem:[%s2589_s6 + $0x80] sm:$0xff] %vm1168_vm8, %v1152_v40 }
 0x134   : > { %v1129_v18 = vsel %vm1038_vm6, %v1036_v2, 0.0  ;;  %v998_v34 = vsel %vm997_vm9, %v2251_v21, %v994_v12 }
 0x135   : > { %1130 = vadd.xlane.f32.xlu0 %v1129_v18  ;;  %v1003_v8 = vsel %vm1000_vm10, %v1002_v11, %v998_v34 }
 0x136   : > { %v1037_v60 = vmul.f32 %v2361_v19, %v1003_v8  ;;  %v1113_v52 = vpop.xlane.xlu0 %1112 }
 0x137   : > { %v1160_v7 = vadd.f32 %v2561_v51, %v1113_v52 }
 0x138   : > { %v1132_v41 = vsel %vm1038_vm6, %v1037_v60, 0.0 }
 0x139   : > { %1133 = vadd.xlane.f32.xlu1 %v1132_v41  ;;  %1193 = vst.msk [vmem:[%s2589_s6 + $0xc0] sm:$0xff] %vm1168_vm8, %v1160_v7 }
 0x13c   : > { %v1116_v45 = vpop.xlane.xlu1 %1115 }
 0x13d   : > { %v1161_v44 = vadd.f32 %v2561_v51, %v1116_v45 }
 0x13f   : > { %1194 = vst.msk [vmem:[%s2589_s6 + $0xc8] sm:$0xff] %vm1168_vm8, %v1161_v44 }
 0x140   : > { %v1092_v21 = vpop.xlane.xlu2 %1091 }
 0x141   : > { %v1153_v47 = vadd.f32 %v2561_v51, %v1092_v21 }
 0x143   : > { %1186 = vst.msk [vmem:[%s2589_s6 + $0x88] sm:$0xff] %vm1168_vm8, %v1153_v47 }
 0x148   : > { %v1044_v19 = vpop.xlane.xlu0 %1043 }
 0x149   : > { %v1137_v22 = vadd.f32 %v2561_v51, %v1044_v19 }
 0x14b   : > { %1170 = vst.msk [vmem:[%s2589_s6 + $0x8] sm:$0xff] %vm1168_vm8, %v1137_v22  ;;  %v1119_v32 = vpop.xlane.xlu2 %1118 }
 0x14c   : > { %v1162_v20 = vadd.f32 %v2561_v51, %v1119_v32 }
 0x14e   : > { %1195 = vst.msk [vmem:[%s2589_s6 + $0xd0] sm:$0xff] %vm1168_vm8, %v1162_v20 }
 0x14f   : > { %v1047_v6 = vpop.xlane.xlu1 %1046 }
 0x150   : > { %v1138_v50 = vadd.f32 %v2561_v51, %v1047_v6 }
 0x152   : > { %1171 = vst.msk [vmem:[%s2589_s6 + $0x10] sm:$0xff] %vm1168_vm8, %v1138_v50 }
 0x157   : > { %v1068_v23 = vpop.xlane.xlu0 %1067 }
 0x158   : > { %v1145_v42 = vadd.f32 %v2561_v51, %v1068_v23 }
 0x15a   : > { %1178 = vst.msk [vmem:[%s2589_s6 + $0x48] sm:$0xff] %vm1168_vm8, %v1145_v42  ;;  %v1074_v38 = vpop.xlane.xlu2 %1073 }
 0x15b   : > { %v1147_v62 = vadd.f32 %v2561_v51, %v1074_v38 }
 0x15d   : > { %1180 = vst.msk [vmem:[%s2589_s6 + $0x58] sm:$0xff] %vm1168_vm8, %v1147_v62 }
 0x15e   : > { %v1071_v9 = vpop.xlane.xlu1 %1070 }
 0x15f   : > { %v1146_v55 = vadd.f32 %v2561_v51, %v1071_v9 }
 0x161   : > { %1179 = vst.msk [vmem:[%s2589_s6 + $0x50] sm:$0xff] %vm1168_vm8, %v1146_v55 }
 0x166   : > { %v1095_v16 = vpop.xlane.xlu0 %1094 }
 0x167   : > { %v1154_v37 = vadd.f32 %v2561_v51, %v1095_v16 }
 0x169   : > { %1187 = vst.msk [vmem:[%s2589_s6 + $0x90] sm:$0xff] %vm1168_vm8, %v1154_v37  ;;  %v1053_v27 = vpop.xlane.xlu2 %1052 }
 0x16a   : > { %v1140_v53 = vadd.f32 %v2561_v51, %v1053_v27 }
 0x16c   : > { %1173 = vst.msk [vmem:[%s2589_s6 + $0x20] sm:$0xff] %vm1168_vm8, %v1140_v53 }
 0x16d   : > { %v1050_v59 = vpop.xlane.xlu1 %1049 }
 0x16e   : > { %v1139_v10 = vadd.f32 %v2561_v51, %v1050_v59 }
 0x170   : > { %1172 = vst.msk [vmem:[%s2589_s6 + $0x18] sm:$0xff] %vm1168_vm8, %v1139_v10 }
 0x174   : > { %v1122_v14 = vpop.xlane.xlu0 %1121 }
 0x175   : > { %v1163_v57 = vadd.f32 %v2561_v51, %v1122_v14 }
 0x177   : > { %1196 = vst.msk [vmem:[%s2589_s6 + $0xd8] sm:$0xff] %vm1168_vm8, %v1163_v57  ;;  %v1101_v30 = vpop.xlane.xlu2 %1100 }
 0x178   : > { %v1156_v28 = vadd.f32 %v2561_v51, %v1101_v30 }
 0x17a   : > { %1189 = vst.msk [vmem:[%s2589_s6 + $0xa0] sm:$0xff] %vm1168_vm8, %v1156_v28  ;;  %v1098_v4 = vpop.xlane.xlu1 %1097 }
 0x17b   : > { %v1155_v63 = vadd.f32 %v2561_v51, %v1098_v4 }
 0x17d   : > { %1188 = vst.msk [vmem:[%s2589_s6 + $0x98] sm:$0xff] %vm1168_vm8, %v1155_v63 }
 0x17e   : > { %v1077_v3 = vpop.xlane.xlu0 %1076 }
 0x17f   : > { %v1148_v17 = vadd.f32 %v2561_v51, %v1077_v3 }
 0x181   : > { %1181 = vst.msk [vmem:[%s2589_s6 + $0x60] sm:$0xff] %vm1168_vm8, %v1148_v17 }
 0x182   : > { %v1056_v61 = vpop.xlane.xlu2 %1055 }
 0x183   : > { %v1141_v0 = vadd.f32 %v2561_v51, %v1056_v61 }
 0x185   : > { %1174 = vst.msk [vmem:[%s2589_s6 + $0x28] sm:$0xff] %vm1168_vm8, %v1141_v0  ;;  %v1125_v25 = vpop.xlane.xlu1 %1124 }
 0x186   : > { %v1164_v26 = vadd.f32 %v2561_v51, %v1125_v25 }
 0x188   : > { %1197 = vst.msk [vmem:[%s2589_s6 + $0xe0] sm:$0xff] %vm1168_vm8, %v1164_v26  ;;  %v1104_v43 = vpop.xlane.xlu0 %1103 }
 0x189   : > { %v1157_v31 = vadd.f32 %v2561_v51, %v1104_v43 }
 0x18b   : > { %1190 = vst.msk [vmem:[%s2589_s6 + $0xa8] sm:$0xff] %vm1168_vm8, %v1157_v31 }
 0x18c   : > { %v1083_v46 = vpop.xlane.xlu2 %1082 }
 0x18d   : > { %v1150_v49 = vadd.f32 %v2561_v51, %v1083_v46 }
 0x18f   : > { %1183 = vst.msk [vmem:[%s2589_s6 + $0x70] sm:$0xff] %vm1168_vm8, %v1150_v49 }
 0x190   : > { %v1080_v5 = vpop.xlane.xlu1 %1079 }
 0x191   : > { %v1149_v24 = vadd.f32 %v2561_v51, %v1080_v5 }
 0x193   : > { %1182 = vst.msk [vmem:[%s2589_s6 + $0x68] sm:$0xff] %vm1168_vm8, %v1149_v24  ;;  %v1059_v54 = vpop.xlane.xlu0 %1058 }
 0x194   : > { %v1142_v36 = vadd.f32 %v2561_v51, %v1059_v54 }
 0x196   : > { %1175 = vst.msk [vmem:[%s2589_s6 + $0x30] sm:$0xff] %vm1168_vm8, %v1142_v36  ;;  %v1110_v1 = vpop.xlane.xlu2 %1109 }
 0x197   : > { %v1159_v56 = vadd.f32 %v2561_v51, %v1110_v1 }
 0x199   : > { %1192 = vst.msk [vmem:[%s2589_s6 + $0xb8] sm:$0xff] %vm1168_vm8, %v1159_v56 }
 0x19a   : > { %v1107_v58 = vpop.xlane.xlu1 %1106 }
 0x19b   : > { %v1158_v29 = vadd.f32 %v2561_v51, %v1107_v58 }
 0x19d   : > { %1191 = vst.msk [vmem:[%s2589_s6 + $0xb0] sm:$0xff] %vm1168_vm8, %v1158_v29 }
 0x19e   : > { %v1086_v13 = vpop.xlane.xlu0 %1085 }
 0x19f   : > { %v1151_v48 = vadd.f32 %v2561_v51, %v1086_v13 }
 0x1a1   : > { %1184 = vst.msk [vmem:[%s2589_s6 + $0x78] sm:$0xff] %vm1168_vm8, %v1151_v48  ;;  %v1128_v33 = vpop.xlane.xlu2 %1127 }
 0x1a2   : > { %v1165_v15 = vadd.f32 %v2561_v51, %v1128_v33 }
 0x1a4   : > { %1198 = vst.msk [vmem:[%s2589_s6 + $0xe8] sm:$0xff] %vm1168_vm8, %v1165_v15  ;;  %v1062_v39 = vpop.xlane.xlu1 %1061 }
 0x1a5   : > { %v1143_v35 = vadd.f32 %v2561_v51, %v1062_v39 }
 0x1a7   : > { %1176 = vst.msk [vmem:[%s2589_s6 + $0x38] sm:$0xff] %vm1168_vm8, %v1143_v35 }
 0x1a8   : > { %v1131_v11 = vpop.xlane.xlu0 %1130 }
 0x1a9   : > { %v1166_v40 = vadd.f32 %v2561_v51, %v1131_v11 }
 0x1ab   : > { %1199 = vst.msk [vmem:[%s2589_s6 + $0xf0] sm:$0xff] %vm1168_vm8, %v1166_v40 }
 0x1ac   : > { %v1134_v2 = vpop.xlane.xlu1 %1133 }
 0x1ad   : > { %v1167_v12 = vadd.f32 %v2561_v51, %v1134_v2 }
 0x1af   : > { %1200 = vst.msk [vmem:[%s2589_s6 + $0xf8] sm:$0xff] %vm1168_vm8, %v1167_v12 }
 0x1b0 PF: > { %s12_s9 = sadd.s32 1, %s1490_s9  }
 0x1b1   : > { %p9_p4 = scmp.ge.s32.totalorder %s12_s9, 4  }
 0x1b3   :  { %11 = sbr.rel (!%p9_p4) target bundleno = 1 (0x1), region = 58 }

</bundles_post_ra>
